<compile_context>
chip_gen: v6e
topology: v6e:2x2x1
jax: 0.10.0
libtpu: 0.0.40
codegen_flags: <defaults>
</compile_context>

<pallas_src>
import functools

import numpy as np
import jax
import jax.numpy as jnp
from jax.experimental import pallas as pl
from jax.experimental.pallas import tpu as pltpu


def _linear_interp_matrix(in_size: int, out_size: int) -> np.ndarray:
    """W (in_size, out_size) such that x @ W == F.interpolate(x, size=out_size,
    mode='linear', align_corners=False) along the last axis (PyTorch semantics)."""
    W = np.zeros((in_size, out_size), dtype=np.float32)
    scale = in_size / out_size
    for j in range(out_size):
        src = max((j + 0.5) * scale - 0.5, 0.0)
        i0 = min(int(np.floor(src)), in_size - 1)
        i1 = min(i0 + 1, in_size - 1)
        lam = src - i0
        W[i0, j] += 1.0 - lam
        W[i1, j] += lam
    return W


@functools.lru_cache(maxsize=None)
def _fused_basis_matrix(n_knots: int, forecast_size: int, out_features: int) -> np.ndarray:
    """(O*K, O*F) float32 matrix folding linear interpolation + the output permute.

    fmat = knots_flat @ Wf  gives  fmat[b, f*O + o] == forecast[b, f, o]  (the PyTorch
    layout after permute(0, 2, 1)), where knots_flat[b, o*K + k] = knots[b, o, k].
    No zero backcast rows: the MXU only contracts over the knot columns."""
    W = _linear_interp_matrix(n_knots, forecast_size)                 # (K, F)
    Wf = np.zeros((out_features * n_knots, out_features * forecast_size), dtype=np.float32)
    for o in range(out_features):
        Wf[o * n_knots:(o + 1) * n_knots, o::out_features] = W        # col = f*O + o
    return Wf


def _identity_basis_kernel(backcast_size, theta_ref, w_ref, fmat_ref):
    # Contract only the knot columns; slice straight from the VMEM ref so Mosaic can
    # stream loads into the MXU instead of pinning the whole (tb, D) tile in vregs.
    knots = theta_ref[:, backcast_size:]
    fmat_ref[...] = jnp.dot(
        knots, w_ref[...], preferred_element_type=jnp.float32
    ).astype(fmat_ref.dtype)


def identity_basis_forward(theta: jax.Array, backcast_size: int, forecast_size: int,
                           out_features: int = 1, row_tile: int | None = None,
                           vmem_limit_bytes: int = 24 * 1024 * 1024):
    B, D = theta.shape
    assert (D - backcast_size) % out_features == 0
    n_knots = (D - backcast_size) // out_features
    OK = out_features * n_knots
    OF = out_features * forecast_size
    dtype = theta.dtype
    itemsize = jnp.dtype(dtype).itemsize
    sublane = max(8, 32 // itemsize)  # 8 for f32, 16 for bf16, 32 for int8

    # Interpolation weights stay float32 (precision matches PyTorch F.interpolate even
    # for bf16 theta); the MXU handles the mixed-precision dot with f32 accumulation.
    wf = jnp.asarray(_fused_basis_matrix(n_knots, forecast_size, out_features))

    # Backcast is a verbatim slice of theta already resident in HBM — not a kernel
    # output (saves the dominant HBM write stream for a mem-bound op).
    backcast = theta[:, :backcast_size]

    # Row tile: derive from the VMEM budget (double-buffered theta tile + output tile
    # + the small constant weight block), capped at 8192 rows, sublane-aligned.
    if row_tile is None:
        budget = int(0.45 * vmem_limit_bytes)
        row_bytes = (D + OF) * itemsize
        avail = max(budget - 2 * OK * OF * 4, 2 * row_bytes * sublane)
        row_tile = (avail // (2 * row_bytes)) // sublane * sublane
        row_tile = min(max(row_tile, sublane), 8192)
        # Prefer >= 2 grid blocks when the batch allows it: keeps both v7x TensorCores
        # busy; the extra ~0.35 us grid step is noise on v5e/v6e.
        sub_rows = -(-B // sublane)
        if sub_rows >= 2:
            half = -(-sub_rows // 2) * sublane
            row_tile = min(row_tile, half)
    tb = max(sublane, (int(row_tile) // sublane) * sublane)
    tb = min(tb, -(-B // sublane) * sublane)

    # Pad the batch to a multiple of the tile (zero-padded tail rows are sliced off).
    b_pad = -(-B // tb) * tb
    theta_p = jnp.pad(theta, ((0, b_pad - B), (0, 0))) if b_pad != B else theta

    kernel = functools.partial(_identity_basis_kernel, backcast_size)
    fmat = pl.pallas_call(
        kernel,
        grid=(b_pad // tb,),
        in_specs=[
            pl.BlockSpec((tb, D), lambda i: (i, 0)),     # theta tile (read once)
            pl.BlockSpec((OK, OF), lambda i: (0, 0)),    # fused weights (constant block)
        ],
        out_specs=pl.BlockSpec((tb, OF), lambda i: (i, 0)),  # lane-dense forecast slab
        out_shape=jax.ShapeDtypeStruct((b_pad, OF), dtype),
        compiler_params=pltpu.CompilerParams(
            dimension_semantics=("parallel",),
            vmem_limit_bytes=vmem_limit_bytes,
        ),
    )(theta_p, wf)

    if b_pad != B:
        fmat = fmat[:B]
    # (B, F*O) -> (B, F, O): view-free reshape; the permute(0, 2, 1) is folded into wf.
    forecast = fmat.reshape(B, forecast_size, out_features)
    return backcast, forecast


def _reference(theta, backcast_size, forecast_size, out_features):
    """Independent NumPy reference matching PyTorch F.interpolate(mode='linear')."""
    theta = np.asarray(theta)
    B, D = theta.shape
    K = (D - backcast_size) // out_features
    backcast = theta[:, :backcast_size]
    knots = theta[:, backcast_size:].reshape(B, out_features, K)
    scale = K / forecast_size
    j = np.arange(forecast_size)
    src = np.maximum((j + 0.5) * scale - 0.5, 0.0)
    i0 = np.minimum(np.floor(src).astype(np.int64), K - 1)
    i1 = np.minimum(i0 + 1, K - 1)
    lam = (src - i0).astype(np.float32)
    interp = knots[..., i0] * (1.0 - lam) + knots[..., i1] * lam      # (B, O, F)
    return backcast, interp.transpose(0, 2, 1)                        # (B, F, O)


if __name__ == "__main__":
    # Case 1: NHITS defaults (out_features=1): input_size=24, h=16, n_freq_downsample=4.
    # row_tile=16 forces the multi-tile + padded-tail path (B=40 -> padded to 48).
    B, backcast_size, forecast_size, out_features, n_knots = 40, 24, 16, 1, 4
    D = backcast_size + out_features * n_knots
    theta1 = jax.random.normal(jax.random.PRNGKey(0), (B, D), dtype=jnp.float32)
    bc1, fc1 = identity_basis_forward(theta1, backcast_size, forecast_size,
                                      out_features, row_tile=16)
    jax.block_until_ready((bc1, fc1))
    rb1, rf1 = _reference(theta1, backcast_size, forecast_size, out_features)
    assert bc1.shape == (B, backcast_size)
    assert fc1.shape == (B, forecast_size, out_features)
    assert np.allclose(np.asarray(bc1), rb1, atol=1e-6)
    assert np.allclose(np.asarray(fc1), rf1, atol=1e-5)

    # Case 2: multi-output basis (out_features=2), automatic tile selection
    # (auto-tiler picks 2 grid blocks of 16 rows for B=32).
    B, backcast_size, forecast_size, out_features, n_knots = 32, 24, 16, 2, 8
    D = backcast_size + out_features * n_knots
    theta2 = jax.random.normal(jax.random.PRNGKey(1), (B, D), dtype=jnp.float32)
    bc2, fc2 = identity_basis_forward(theta2, backcast_size, forecast_size, out_features)
    jax.block_until_ready((bc2, fc2))
    rb2, rf2 = _reference(theta2, backcast_size, forecast_size, out_features)
    assert bc2.shape == (B, backcast_size)
    assert fc2.shape == (B, forecast_size, out_features)
    assert np.allclose(np.asarray(bc2), rb2, atol=1e-6)
    assert np.allclose(np.asarray(fc2), rf2, atol=1e-5)

    print("KERNEL_OK")
</pallas_src>

<mosaic_0001>
module attributes {stable_mosaic.version = 11 : i64} {
  func.func @_identity_basis_kernel(%arg0: i32, %arg1: memref<16x28xf32, #tpu.memory_space<vmem>>, %arg2: memref<4x16xf32, #tpu.memory_space<vmem>>, %arg3: memref<16x16xf32, #tpu.memory_space<vmem>>) attributes {dimension_semantics = [#tpu.dimension_semantics<parallel>], iteration_bounds = array<i64: 3>, scalar_prefetch = 0 : i64, scratch_operands = 0 : i64, tpu.core_type = #tpu.core_type<tc>, window_params = [{transform_indices = @transform_0, window_bounds = array<i64: 16, 28>}, {pipeline_mode = #tpu.pipeline_mode<synchronous>, transform_indices = @transform_1, window_bounds = array<i64: 4, 16>}, {transform_indices = @transform_2, window_bounds = array<i64: 16, 16>}]} {
    %c0 = arith.constant 0 : index
    %c24 = arith.constant 24 : index
    %0 = vector.load %arg1[%c0, %c24] : memref<16x28xf32, #tpu.memory_space<vmem>>, vector<16x4xf32>
    %c0_0 = arith.constant 0 : index
    %c0_1 = arith.constant 0 : index
    %1 = vector.load %arg2[%c0_0, %c0_1] : memref<4x16xf32, #tpu.memory_space<vmem>>, vector<4x16xf32>
    %cst = arith.constant dense<0.000000e+00> : vector<16x16xf32>
    %2 = tpu.matmul %0, %1, %cst {dimension_numbers = #tpu.dot_dimension_numbers<[1], [0], [0], [1], [0, 0, 1, 1], [], []>} : vector<16x4xf32>, vector<4x16xf32>, vector<16x16xf32> -> vector<16x16xf32>
    %c0_2 = arith.constant 0 : index
    %c0_3 = arith.constant 0 : index
    %3 = vector.load %arg3[%c0_2, %c0_3] : memref<16x16xf32, #tpu.memory_space<vmem>>, vector<16x16xf32>
    tpu.vector_store %arg3[%c0_2, %c0_3], %2 {strides = array<i32>} : memref<16x16xf32, #tpu.memory_space<vmem>>, vector<16x16xf32>,
    return
  }
  func.func @transform_0(%arg0: i32) -> (i32, i32) {
    %c0_i32 = arith.constant 0 : i32
    %c0_i32_0 = arith.constant 0 : i32
    return %arg0, %c0_i32 : i32, i32
  }
  func.func @transform_1(%arg0: i32) -> (i32, i32) {
    %c0_i32 = arith.constant 0 : i32
    %c0_i32_0 = arith.constant 0 : i32
    %c0_i32_1 = arith.constant 0 : i32
    return %c0_i32, %c0_i32_0 : i32, i32
  }
  func.func @transform_2(%arg0: i32) -> (i32, i32) {
    %c0_i32 = arith.constant 0 : i32
    %c0_i32_0 = arith.constant 0 : i32
    return %arg0, %c0_i32 : i32, i32
  }
}

</mosaic_0001>

<bundles_post_ra>
// kernel: tpu_custom_call.1
= control target key start
LH: loop header
LB: loop body
LE: loop exit
PB: predicated region body
PF: predicated region fallthrough
CT: control target
= control target key end

     0   :  { %s354_s9 = smov 0   ;;  %s374_s0 = inlined_call_operand.vmem [shape: f32[48,28], index: 0, kind: input, shape index: {}]   ;;  %s375_s1 = inlined_call_operand.vmem [shape: f32[4,16], index: 1, kind: input, shape index: {}]   ;;  %s376_s2 = inlined_call_operand.vmem [shape: f32[48,16], index: 2, kind: output, shape index: {}]  }
   0x1 LB: > { %s299_s10 = sadd.s32 4294967295, %s336_s9   ;;  %p303_p0 = scmp.ge.s32.totalorder %s336_s9, 1  ;;  %s336_s9 = sphi %s354_s9, %s12_s9  }
   0x2   : > { %p113_p1 = scmp.lt.s32.totalorder %s336_s9, 4 }
   0x4   : > { %p114_p2 = pnand %p303_p0, %p113_p1 }
   0x5   : > { %s304_s11 = sshll.u32 (!%p114_p2), %s299_s10, 1  ;;  %s338_s18 = smov (!%p114_p2), 104  }
   0x6   : > { %117 = sbr.rel (%p114_p2) target bundleno = 330 (0x14a), region = 28  ;;  %p136_p3 = scmp.lt.s32.totalorder (!%p114_p2), %s304_s11, 5 }
   0xb   : > { %v149_v0 = vld [vmem:[%s375_s1] sm:$0xf]  ;;  %vm161_vm0 = vcmask 1043456   ;;  %s378_s11 = smov (!%p136_p3, %s304_s11), 5  ;;  %vm156_vm1 = vcmask 31744   ;;  %vm240_vm2 = vcmask 130048  }
   0xc   : > { %316 = vmatprep.subr.msk.mxu0 %vm161_vm0, %v149_v0  ;;  %s305_s14 = sshll.u32 %s378_s11, 3 }
   0xd   : > { %317 = vmatpush3.msk.msra.mxu0 %vm161_vm0, %v149_v0  ;;  %s139_s17 = scalar_lea.vmem %s374_s0, %s305_s14  ;;  %s145_s21 = scalar_lea.vmem %s376_s2, %s305_s14 }
   0xe   : > { %v147_v1 = vld [vmem:[%s139_s17] sm:$0xff]  ;;  %v148_v2 = vld [vmem:[%s139_s17 + $0x8] sm:$0xff] }
   0xf   : > { %152 = vrot.lane.b32.xlu0 %v147_v1, %s338_s18 }
  0x13   : > { %154 = vrot.lane.b32.xlu0 %v148_v2, %s338_s18 }
  0x81   : > { %v153_v3 = vpop.permute.xlu0 %152 }
  0x82   : > { %318 = vmatprep.mubr.msk.f32.mxu0 %vm156_vm1, %v153_v3 }
  0x85   : > { %v155_v4 = vpop.permute.xlu0 %154 }
  0x86   : > { %319 = vmatmul.mubr.msk.f32.vlgmr.msra.gmra.mxu0 %vm156_vm1, %v155_v4 }
 0x146   : > { %v320_v5 = vpop.f32.mrf.mxu0 }
 0x147   : > { %242 = vst.msk [vmem:[%s145_s21 + $0x8] sm:$0xff] %vm240_vm2, %v320_v5 }
 0x148   : > { %v231_v6 = vpop.f32.mrf.mxu0 }
 0x149   : > { %241 = vst.msk [vmem:[%s145_s21] sm:$0xff] %vm240_vm2, %v231_v6 }
 0x14a PF: > { %s12_s9 = sadd.s32 1, %s336_s9  }
 0x14b   : > { %p9_p4 = scmp.ge.s32.totalorder %s12_s9, 5  }
 0x14d   :  { %11 = sbr.rel (!%p9_p4) target bundleno = 1 (0x1), region = 58 }

</bundles_post_ra>
